<compile_context>
chip_gen: v6e
topology: v6e:2x2x1
jax: 0.10.0
libtpu: 0.0.40
codegen_flags: <defaults>
</compile_context>

<pallas_src>
import functools

import jax
import jax.numpy as jnp
from jax import lax
from jax.experimental import pallas as pl
from jax.experimental.pallas import tpu as pltpu


def _bce_kernel(*refs, rows_tile, strip_rows, tiles_per_core, L, valid_elems,
                need_mask, weighted, pw_per_element, unroll):
    if weighted:
        preds_ref, target_ref, pwm1_ref, out_ref, acc_ref = refs
    else:
        preds_ref, target_ref, out_ref, acc_ref = refs
        pwm1_ref = None

    p = pl.program_id(0)          # "parallel" axis (megacore shard on v7x)
    i = pl.program_id(1)          # "arbitrary" reduction axis (row tiles)
    tile_row0 = (p * tiles_per_core + i) * rows_tile

    @pl.when(i == 0)
    def _init():
        acc_ref[...] = jnp.zeros_like(acc_ref)

    num_strips = rows_tile // strip_rows

    def _strip(s, acc, masked):
        # One strip keeps the whole f32 elementwise chain in vregs.
        r0 = pl.multiple_of(s * strip_rows, strip_rows)
        x = preds_ref[pl.ds(r0, strip_rows), :].astype(jnp.float32)
        y = target_ref[pl.ds(r0, strip_rows), :].astype(jnp.float32)
        # Stable softplus(-x) = max(-x, 0) + log1p(exp(-|x|))  (EUP exp/log)
        sp = jnp.maximum(-x, 0.0) + jnp.log1p(jnp.exp(-jnp.abs(x)))
        if weighted:
            if pw_per_element:
                pwm1 = pwm1_ref[pl.ds(r0, strip_rows), :]
            else:
                pwm1 = pwm1_ref[...]                    # (1, L) -> broadcasts
            loss = (1.0 - y) * x + (1.0 + pwm1 * y) * sp
        else:
            loss = (1.0 - y) * x + sp
        if masked:
            # Flat-element mask: only the boundary tile ever executes this.
            row = tile_row0 + r0 + lax.broadcasted_iota(jnp.int32, loss.shape, 0)
            lane = lax.broadcasted_iota(jnp.int32, loss.shape, 1)
            loss = jnp.where(row * L + lane < valid_elems, loss, 0.0)
        # Collapse groups of 8 rows with plain VPU adds (no cross-lane work).
        return acc + loss.reshape(strip_rows // 8, 8, L).sum(axis=0)

    def _accumulate(masked):
        zero = jnp.zeros((8, L), jnp.float32)
        if num_strips == 1:
            acc = _strip(0, zero, masked)
        else:
            acc = lax.fori_loop(0, num_strips,
                                functools.partial(_strip, masked=masked),
                                zero, unroll=unroll)
        acc_ref[...] += acc

    if not need_mask:
        _accumulate(masked=False)
    else:
        fully_valid = (tile_row0 + rows_tile) * L <= valid_elems

        @pl.when(fully_valid)
        def _steady():
            _accumulate(masked=False)

        @pl.when(jnp.logical_and(jnp.logical_not(fully_valid),
                                 tile_row0 * L < valid_elems))
        def _edge():
            _accumulate(masked=True)
        # Fully-overhang (clamped) tiles fall through both branches: no compute.

    @pl.when(i == pl.num_programs(1) - 1)
    def _finalize():
        # One cross-lane/cross-sublane reduce per core, at the very end.
        out_ref[0, 0] = jnp.sum(acc_ref[...])


def sigmoid_cross_entropy_loss(preds, target, class_weights=None, *,
                               rows_tile=None):
    """Scalar mean BCE-with-logits loss over a 2D [N, C] batch."""
    if preds.ndim != 2:
        raise RuntimeError(
            "SigmoidCrossEntropyLoss currently only supported for 2D tensors.")
    n, c = preds.shape
    n_elems = n * c
    weighted = class_weights is not None

    # ---- device-dependent tuning --------------------------------------------
    try:
        kind = jax.devices()[0].device_kind.lower()
    except Exception:  # pragma: no cover - defensive
        kind = ""
    is_v7 = "v7" in kind
    num_cores = 2 if is_v7 else 1                  # leading "parallel" axis
    target_tile_bytes = (2 if is_v7 else 6) * 1024 * 1024   # per input/buffer
    vmem_limit = (32 if is_v7 else 64) * 1024 * 1024

    # ---- choose a lane-dense 2-D view (rows, L) of the [N, C] problem -------
    pw_per_element = False
    pwm1_in = None
    if c % 128 == 0:
        L = c
        x2, y2 = preds, target
        if weighted:
            pwm1_in = jnp.asarray(class_weights, jnp.float32).reshape(1, c) - 1.0
    else:
        # Flatten to 128-wide rows; zero-pad the tail (masked in-kernel).
        L = 128
        rows_flat = pl.cdiv(n_elems, 128)
        pad = rows_flat * 128 - n_elems

        def to_lane_dense(a):
            flat = a.reshape(-1)
            if pad:
                flat = jnp.pad(flat, (0, pad))
            return flat.reshape(rows_flat, 128)

        x2 = to_lane_dense(preds)
        y2 = to_lane_dense(target)
        if weighted:
            pw = jnp.asarray(class_weights, jnp.float32).reshape(c)
            if 128 % c == 0:
                # Per-class pattern repeats identically inside every 128-lane row.
                pwm1_in = (jnp.tile(pw, 128 // c) - 1.0).reshape(1, 128)
            else:
                # TODO(synk): C neither multiple nor divisor of 128 -- pass a
                # per-element (pos_weight - 1) stream instead of an in-kernel
                # gather; costs one extra f32 input on this fallback path.
                pw_per_element = True
                pwm1_in = to_lane_dense(
                    jnp.broadcast_to(pw - 1.0, (n, c)).astype(jnp.float32))
    rows = x2.shape[0]

    if pw_per_element:
        target_tile_bytes //= 2        # extra f32 stream -> keep VMEM in budget

    # ---- tiling --------------------------------------------------------------
    itemsize = jnp.dtype(preds.dtype).itemsize
    rows8 = max(8, pl.cdiv(rows, 8) * 8)
    # ~8K f32 elements live per strip keeps the chain in vregs (no spills).
    strip_rows = min(rows8, max(8, (8192 // L) // 8 * 8))
    if rows_tile is None:
        rt = max(strip_rows,
                 (target_tile_bytes // max(1, L * itemsize))
                 // strip_rows * strip_rows)
    else:
        rt = max(8, (int(rows_tile) + 7) // 8 * 8)
        strip_rows = min(strip_rows, rt)
    rt = min(rt, rows8)
    rows_tile = max(strip_rows, pl.cdiv(rt, strip_rows) * strip_rows)
    num_strips = rows_tile // strip_rows
    unroll = num_strips if num_strips <= 8 else 8

    total_tiles = pl.cdiv(rows, rows_tile)
    tiles_per_core = pl.cdiv(total_tiles, num_cores)
    covered_elems = num_cores * tiles_per_core * rows_tile * L
    need_mask = covered_elems != n_elems

    def row_block(pid, i):
        # Clamp so overhanging iterations re-read an already resident block;
        # their contribution is skipped in-kernel.
        return (jnp.minimum(pid * tiles_per_core + i, total_tiles - 1), 0)

    in_specs = [pl.BlockSpec((rows_tile, L), row_block),        # preds
                pl.BlockSpec((rows_tile, L), row_block)]        # target
    inputs = [x2, y2]
    if weighted:
        if pw_per_element:
            in_specs.append(pl.BlockSpec((rows_tile, L), row_block))
        else:
            in_specs.append(pl.BlockSpec((1, L), lambda pid, i: (0, 0)))
        inputs.append(pwm1_in)

    kernel = functools.partial(
        _bce_kernel, rows_tile=rows_tile, strip_rows=strip_rows,
        tiles_per_core=tiles_per_core, L=L, valid_elems=n_elems,
        need_mask=need_mask, weighted=weighted,
        pw_per_element=pw_per_element, unroll=unroll)

    in_bytes = 2 * rows * L * itemsize
    if weighted:
        in_bytes += rows * L * 4 if pw_per_element else 4 * L
    cost = pl.CostEstimate(
        flops=(9 if weighted else 6) * n_elems,
        transcendentals=2 * n_elems,
        bytes_accessed=int(in_bytes + 4 * num_cores))

    partials = pl.pallas_call(
        kernel,
        out_shape=jax.ShapeDtypeStruct((num_cores, 1), jnp.float32),
        grid_spec=pltpu.PrefetchScalarGridSpec(
            num_scalar_prefetch=0,
            grid=(num_cores, tiles_per_core),
            in_specs=in_specs,
            out_specs=pl.BlockSpec((1, 1), lambda pid, i: (pid, 0),
                                   memory_space=pltpu.SMEM),
            scratch_shapes=[pltpu.VMEM((8, L), jnp.float32)],
        ),
        compiler_params=pltpu.CompilerParams(
            dimension_semantics=("parallel", "arbitrary"),
            vmem_limit_bytes=vmem_limit),
        cost_estimate=cost,
    )(*inputs)

    # Sum the per-core partial sums and apply the mean once, in the wrapper.
    return jnp.sum(partials) / jnp.float32(n_elems)


if __name__ == "__main__":
    key = jax.random.PRNGKey(0)
    ks = jax.random.split(key, 8)

    def ref_loss(x, y, pw=None):
        x = x.astype(jnp.float32)
        y = y.astype(jnp.float32)
        sp = jnp.maximum(-x, 0.0) + jnp.log1p(jnp.exp(-jnp.abs(x)))
        if pw is None:
            l = (1.0 - y) * x + sp
        else:
            l = (1.0 - y) * x + (1.0 + (pw[None, :] - 1.0) * y) * sp
        return jnp.mean(l)

    # Case 1: [8, 32] f32 logits (lane-dense flatten path), unweighted.
    N, C = 8, 32
    preds = jax.random.normal(ks[0], (N, C), dtype=jnp.float32)
    target = (jax.random.uniform(ks[1], (N, C)) > 0.5).astype(jnp.float32)
    out1 = sigmoid_cross_entropy_loss(preds, target)
    jax.block_until_ready(out1)
    assert jnp.allclose(out1, ref_loss(preds, target), atol=1e-5, rtol=1e-5)

    # Case 2: per-class pos_weight with C dividing 128 (tiled-weight path).
    cw = jnp.linspace(0.5, 2.0, C, dtype=jnp.float32)
    out2 = sigmoid_cross_entropy_loss(preds, target, cw)
    jax.block_until_ready(out2)
    assert jnp.allclose(out2, ref_loss(preds, target, cw), atol=1e-5, rtol=1e-5)

    # Case 3: bf16 logits, C multiple of 128 (no flatten), forced small row
    # tile to exercise the multi-tile accumulate path.
    N3, C3 = 24, 128
    p3 = jax.random.normal(ks[2], (N3, C3), dtype=jnp.float32).astype(jnp.bfloat16)
    t3 = (jax.random.uniform(ks[3], (N3, C3)) > 0.5).astype(jnp.bfloat16)
    out3 = sigmoid_cross_entropy_loss(p3, t3, rows_tile=8)
    jax.block_until_ready(out3)
    assert jnp.allclose(out3, ref_loss(p3, t3), atol=1e-4, rtol=1e-4)

    # Case 4: C neither a multiple nor a divisor of 128, with class weights
    # (lane-dense fallback + per-element pos_weight stream).
    N4, C4 = 16, 24
    p4 = jax.random.normal(ks[4], (N4, C4), dtype=jnp.float32)
    t4 = (jax.random.uniform(ks[5], (N4, C4)) > 0.5).astype(jnp.float32)
    cw4 = jnp.linspace(0.25, 3.0, C4, dtype=jnp.float32)
    out4 = sigmoid_cross_entropy_loss(p4, t4, cw4)
    jax.block_until_ready(out4)
    assert jnp.allclose(out4, ref_loss(p4, t4, cw4), atol=1e-5, rtol=1e-5)

    # Case 5: ragged element count (N*C not a multiple of 128) -> zero-padded
    # tail masked in-kernel.
    N5, C5 = 5, 48
    p5 = jax.random.normal(ks[6], (N5, C5), dtype=jnp.float32)
    t5 = (jax.random.uniform(ks[7], (N5, C5)) > 0.5).astype(jnp.float32)
    out5 = sigmoid_cross_entropy_loss(p5, t5)
    jax.block_until_ready(out5)
    assert jnp.allclose(out5, ref_loss(p5, t5), atol=1e-5, rtol=1e-5)

    print("KERNEL_OK")
</pallas_src>

<mosaic_0001>
module attributes {stable_mosaic.version = 11 : i64} {
  func.func @_bce_kernel(%arg0: i32, %arg1: i32, %arg2: memref<8x128xf32, #tpu.memory_space<vmem>>, %arg3: memref<8x128xf32, #tpu.memory_space<vmem>>, %arg4: memref<1x1xf32, #tpu.memory_space<smem>>, %arg5: memref<8x128xf32, #tpu.memory_space<vmem>>) attributes {dimension_semantics = [#tpu.dimension_semantics<parallel>, #tpu.dimension_semantics<arbitrary>], iteration_bounds = array<i64: 1, 1>, scalar_prefetch = 0 : i64, scratch_operands = 1 : i64, tpu.core_type = #tpu.core_type<tc>, window_params = [{transform_indices = @transform_0, window_bounds = array<i64: 8, 128>}, {transform_indices = @transform_1, window_bounds = array<i64: 8, 128>}, {transform_indices = @transform_2, window_bounds = array<i64: 1, 1>}]} {
    %c1_i32 = arith.constant 1 : i32
    %0 = arith.muli %arg0, %c1_i32 : i32
    %1 = arith.addi %0, %arg1 : i32
    %c8_i32 = arith.constant 8 : i32
    %2 = arith.muli %1, %c8_i32 : i32
    %c0_i32 = arith.constant 0 : i32
    %3 = arith.cmpi eq, %arg1, %c0_i32 : i32
    %4 = arith.extui %3 : i1 to i32
    %c0_i32_0 = arith.constant 0 : i32
    %5 = arith.cmpi ne, %4, %c0_i32_0 : i32
    scf.if %5 {
      %cst = arith.constant 0.000000e+00 : f32
      %20 = vector.broadcast %cst : f32 to vector<8x128xf32>
      %c0 = arith.constant 0 : index
      %c0_8 = arith.constant 0 : index
      %21 = vector.load %arg5[%c0, %c0_8] : memref<8x128xf32, #tpu.memory_space<vmem>>, vector<8x128xf32>
      tpu.vector_store %arg5[%c0, %c0_8], %20 {strides = array<i32>} : memref<8x128xf32, #tpu.memory_space<vmem>>, vector<8x128xf32>,
    } else {
    }
    %c8_i32_1 = arith.constant 8 : i32
    %6 = arith.addi %2, %c8_i32_1 : i32
    %c128_i32 = arith.constant 128 : i32
    %7 = arith.muli %6, %c128_i32 : i32
    %c256_i32 = arith.constant 256 : i32
    %8 = arith.cmpi sle, %7, %c256_i32 : i32
    %9 = arith.extui %8 : i1 to i32
    %c0_i32_2 = arith.constant 0 : i32
    %10 = arith.cmpi ne, %9, %c0_i32_2 : i32
    scf.if %10 {
      %cst = arith.constant 0.000000e+00 : f32
      %20 = vector.broadcast %cst : f32 to vector<8x128xf32>
      %c0_i32_8 = arith.constant 0 : i32
      %21 = tpu.assume_multiple %c0_i32_8, 8 : i32
      %22 = arith.index_cast %21 : i32 to index
      %c0 = arith.constant 0 : index
      %23 = vector.load %arg2[%22, %c0] : memref<8x128xf32, #tpu.memory_space<vmem>>, vector<8x128xf32>
      %24 = arith.index_cast %21 : i32 to index
      %c0_9 = arith.constant 0 : index
      %25 = vector.load %arg3[%24, %c0_9] : memref<8x128xf32, #tpu.memory_space<vmem>>, vector<8x128xf32>
      %cst_10 = arith.constant 0.000000e+00 : f32
      %26 = vector.broadcast %cst_10 : f32 to vector<8x128xf32>
      %27 = arith.subf %26, %23 : vector<8x128xf32>
      %cst_11 = arith.constant 0.000000e+00 : f32
      %28 = vector.broadcast %cst_11 : f32 to vector<8x128xf32>
      %29 = arith.maximumf %27, %28 : vector<8x128xf32>
      %30 = math.absf %23 : vector<8x128xf32>
      %cst_12 = arith.constant 0.000000e+00 : f32
      %31 = vector.broadcast %cst_12 : f32 to vector<8x128xf32>
      %32 = arith.subf %31, %30 : vector<8x128xf32>
      %33 = math.exp %32 : vector<8x128xf32>
      %34 = math.log1p %33 : vector<8x128xf32>
      %35 = arith.addf %29, %34 : vector<8x128xf32>
      %cst_13 = arith.constant 1.000000e+00 : f32
      %36 = vector.broadcast %cst_13 : f32 to vector<8x128xf32>
      %37 = arith.subf %36, %25 : vector<8x128xf32>
      %38 = arith.mulf %37, %23 : vector<8x128xf32>
      %39 = arith.addf %38, %35 : vector<8x128xf32>
      %40 = vector.shape_cast %39 : vector<8x128xf32> to vector<1x8x128xf32>
      %cst_14 = arith.constant dense<0.000000e+00> : vector<8x128xf32>
      %41 = vector.multi_reduction <add>, %40, %cst_14 [0] : vector<1x8x128xf32> to vector<8x128xf32>
      %42 = arith.addf %20, %41 : vector<8x128xf32>
      %c0_15 = arith.constant 0 : index
      %c0_16 = arith.constant 0 : index
      %43 = vector.load %arg5[%c0_15, %c0_16] : memref<8x128xf32, #tpu.memory_space<vmem>>, vector<8x128xf32>
      %44 = arith.addf %43, %42 : vector<8x128xf32>
      %c0_17 = arith.constant 0 : index
      %c0_18 = arith.constant 0 : index
      %45 = vector.load %arg5[%c0_17, %c0_18] : memref<8x128xf32, #tpu.memory_space<vmem>>, vector<8x128xf32>
      tpu.vector_store %arg5[%c0_17, %c0_18], %44 {strides = array<i32>} : memref<8x128xf32, #tpu.memory_space<vmem>>, vector<8x128xf32>,
    } else {
    }
    %true = arith.constant true
    %11 = arith.xori %8, %true : i1
    %c128_i32_3 = arith.constant 128 : i32
    %12 = arith.muli %2, %c128_i32_3 : i32
    %c256_i32_4 = arith.constant 256 : i32
    %13 = arith.cmpi slt, %12, %c256_i32_4 : i32
    %14 = arith.andi %11, %13 : i1
    %15 = arith.extui %14 : i1 to i32
    %c0_i32_5 = arith.constant 0 : i32
    %16 = arith.cmpi ne, %15, %c0_i32_5 : i32
    scf.if %16 {
      %cst = arith.constant 0.000000e+00 : f32
      %20 = vector.broadcast %cst : f32 to vector<8x128xf32>
      %c0_i32_8 = arith.constant 0 : i32
      %21 = tpu.assume_multiple %c0_i32_8, 8 : i32
      %22 = arith.index_cast %21 : i32 to index
      %c0 = arith.constant 0 : index
      %23 = vector.load %arg2[%22, %c0] : memref<8x128xf32, #tpu.memory_space<vmem>>, vector<8x128xf32>
      %24 = arith.index_cast %21 : i32 to index
      %c0_9 = arith.constant 0 : index
      %25 = vector.load %arg3[%24, %c0_9] : memref<8x128xf32, #tpu.memory_space<vmem>>, vector<8x128xf32>
      %cst_10 = arith.constant 0.000000e+00 : f32
      %26 = vector.broadcast %cst_10 : f32 to vector<8x128xf32>
      %27 = arith.subf %26, %23 : vector<8x128xf32>
      %cst_11 = arith.constant 0.000000e+00 : f32
      %28 = vector.broadcast %cst_11 : f32 to vector<8x128xf32>
      %29 = arith.maximumf %27, %28 : vector<8x128xf32>
      %30 = math.absf %23 : vector<8x128xf32>
      %cst_12 = arith.constant 0.000000e+00 : f32
      %31 = vector.broadcast %cst_12 : f32 to vector<8x128xf32>
      %32 = arith.subf %31, %30 : vector<8x128xf32>
      %33 = math.exp %32 : vector<8x128xf32>
      %34 = math.log1p %33 : vector<8x128xf32>
      %35 = arith.addf %29, %34 : vector<8x128xf32>
      %cst_13 = arith.constant 1.000000e+00 : f32
      %36 = vector.broadcast %cst_13 : f32 to vector<8x128xf32>
      %37 = arith.subf %36, %25 : vector<8x128xf32>
      %38 = arith.mulf %37, %23 : vector<8x128xf32>
      %39 = arith.addf %38, %35 : vector<8x128xf32>
      %40 = arith.addi %2, %21 : i32
      %41 = tpu.iota {dimensions = array<i32: 0>} : vector<8x128xi32>
      %42 = vector.broadcast %40 : i32 to vector<8x128xi32>
      %43 = arith.addi %42, %41 : vector<8x128xi32>
      %44 = tpu.iota {dimensions = array<i32: 1>} : vector<8x128xi32>
      %c128_i32_14 = arith.constant 128 : i32
      %45 = vector.broadcast %c128_i32_14 : i32 to vector<8x128xi32>
      %46 = arith.muli %43, %45 : vector<8x128xi32>
      %47 = arith.addi %46, %44 : vector<8x128xi32>
      %c256_i32_15 = arith.constant 256 : i32
      %48 = vector.broadcast %c256_i32_15 : i32 to vector<8x128xi32>
      %49 = arith.cmpi slt, %47, %48 : vector<8x128xi32>
      %cst_16 = arith.constant 0.000000e+00 : f32
      %50 = vector.broadcast %cst_16 : f32 to vector<8x128xf32>
      %51 = arith.select %49, %39, %50 : vector<8x128xi1>, vector<8x128xf32>
      %52 = vector.shape_cast %51 : vector<8x128xf32> to vector<1x8x128xf32>
      %cst_17 = arith.constant dense<0.000000e+00> : vector<8x128xf32>
      %53 = vector.multi_reduction <add>, %52, %cst_17 [0] : vector<1x8x128xf32> to vector<8x128xf32>
      %54 = arith.addf %20, %53 : vector<8x128xf32>
      %c0_18 = arith.constant 0 : index
      %c0_19 = arith.constant 0 : index
      %55 = vector.load %arg5[%c0_18, %c0_19] : memref<8x128xf32, #tpu.memory_space<vmem>>, vector<8x128xf32>
      %56 = arith.addf %55, %54 : vector<8x128xf32>
      %c0_20 = arith.constant 0 : index
      %c0_21 = arith.constant 0 : index
      %57 = vector.load %arg5[%c0_20, %c0_21] : memref<8x128xf32, #tpu.memory_space<vmem>>, vector<8x128xf32>
      tpu.vector_store %arg5[%c0_20, %c0_21], %56 {strides = array<i32>} : memref<8x128xf32, #tpu.memory_space<vmem>>, vector<8x128xf32>,
    } else {
    }
    %c0_i32_6 = arith.constant 0 : i32
    %17 = arith.cmpi eq, %arg1, %c0_i32_6 : i32
    %18 = arith.extui %17 : i1 to i32
    %c0_i32_7 = arith.constant 0 : i32
    %19 = arith.cmpi ne, %18, %c0_i32_7 : i32
    scf.if %19 {
      %c0 = arith.constant 0 : index
      %c0_8 = arith.constant 0 : index
      %20 = vector.load %arg5[%c0, %c0_8] : memref<8x128xf32, #tpu.memory_space<vmem>>, vector<8x128xf32>
      %21 = vector.shape_cast %20 : vector<8x128xf32> to vector<1x8x128xf32>
      %cst = arith.constant dense<0.000000e+00> : vector<1xf32>
      %22 = vector.multi_reduction <add>, %21, %cst [1, 2] : vector<1x8x128xf32> to vector<1xf32>
      %23 = vector.shape_cast %22 : vector<1xf32> to vector<1x1x1xf32>
      %24 = vector.extract %23[0, 0, 0] : f32 from vector<1x1x1xf32>
      %c0_9 = arith.constant 0 : index
      %c0_10 = arith.constant 0 : index
      %25 = memref.load %arg4[%c0_9, %c0_10] : memref<1x1xf32, #tpu.memory_space<smem>>
      memref.store %24, %arg4[%c0_9, %c0_10] : memref<1x1xf32, #tpu.memory_space<smem>>
    } else {
    }
    return
  }
  func.func @transform_0(%arg0: i32, %arg1: i32) -> (i32, i32) {
    %c1_i32 = arith.constant 1 : i32
    %0 = arith.muli %arg0, %c1_i32 : i32
    %1 = arith.addi %0, %arg1 : i32
    %c0_i32 = arith.constant 0 : i32
    %2 = arith.minsi %1, %c0_i32 : i32
    %c0_i32_0 = arith.constant 0 : i32
    %c0_i32_1 = arith.constant 0 : i32
    return %2, %c0_i32_0 : i32, i32
  }
  func.func @transform_1(%arg0: i32, %arg1: i32) -> (i32, i32) {
    %c1_i32 = arith.constant 1 : i32
    %0 = arith.muli %arg0, %c1_i32 : i32
    %1 = arith.addi %0, %arg1 : i32
    %c0_i32 = arith.constant 0 : i32
    %2 = arith.minsi %1, %c0_i32 : i32
    %c0_i32_0 = arith.constant 0 : i32
    %c0_i32_1 = arith.constant 0 : i32
    return %2, %c0_i32_0 : i32, i32
  }
  func.func @transform_2(%arg0: i32, %arg1: i32) -> (i32, i32) {
    %c0_i32 = arith.constant 0 : i32
    %c0_i32_0 = arith.constant 0 : i32
    return %arg0, %c0_i32 : i32, i32
  }
}

</mosaic_0001>

<bundles_post_ra>
// kernel: tpu_custom_call.1
= control target key start
LH: loop header
LB: loop body
LE: loop exit
PB: predicated region body
PF: predicated region fallthrough
CT: control target
= control target key end

     0   :  { %7 = vsyncpa [#allocation4], 0  ;;  %s283_s0 = inlined_call_operand.hbm [shape: f32[2,128], index: 0, kind: input, shape index: {}]   ;;  %s284_s1 = inlined_call_operand.hbm [shape: f32[2,128], index: 1, kind: input, shape index: {}]   ;;  %s285_s2 = inlined_call_operand.hbm [shape: f32[1,1], index: 2, kind: output, shape index: {}]  }
   0x1   :  { %8 = vsyncpa [#allocation7], 0 }
   0x2   :  { %9 = vsyncpa [#allocation5], 0 }
   0x3   :  { %20 = vsyncadd [#allocation4], 96  ;;  %s254_s9 = smov [#allocation3]  }
   0x4   :  { %s25_s10 = sshll.u32 %s254_s9, 4  ;;  %s26_s10 = int_to_ptr.vmem [resolvable:$true] %s25_s10 }
   0x5   :  { %s208_s11 = scalar_lea.vmem %s26_s10, 32  ;;  %s212_s12 = scalar_lea.vmem %s26_s10, 128 }
   0x6   :  { %p209_p0 = scmp.ne.s32.totalorder %s26_s10, %s208_s11  ;;  %p213_p1 = scmp.lt.s32.totalorder %s26_s10, %s26_s10 }
   0x7   :  { %p214_p2 = scmp.lt.s32.totalorder %s212_s12, %s208_s11 }
   0x9   :  { %p215_p3 = por %p214_p2, %p213_p1 }
   0xb   :  { %p216_p4 = pnand %p215_p3, %p209_p0 }
   0xd   :  { %219 = shalt.err (!%p216_p4)
}
   0xe   :  { %s255_s13 = smov 32   ;;  %s256_s14 = smov 2  }
   0xf   :  { %31 = dma.hbm_to_vmem [thread:$0]  %s283_s0, 32, %s26_s10, [#allocation4], %s255_s13, %s255_s13, %s256_s14  }
  0x10   :  { %42 = vsyncadd [#allocation7], 96  ;;  %s257_s17 = smov [#allocation6]  }
  0x11   :  { %s47_s18 = sshll.u32 %s257_s17, 4  ;;  %s48_s18 = int_to_ptr.vmem [resolvable:$true] %s47_s18 }
  0x12   :  { %s228_s19 = scalar_lea.vmem %s48_s18, 32  ;;  %s232_s20 = scalar_lea.vmem %s48_s18, 128 }
  0x13   :  { %p229_p5 = scmp.ne.s32.totalorder %s48_s18, %s228_s19  ;;  %p233_p6 = scmp.lt.s32.totalorder %s48_s18, %s48_s18 }
  0x14   :  { %p234_p7 = scmp.lt.s32.totalorder %s232_s20, %s228_s19 }
  0x16   :  { %p235_p8 = por %p234_p7, %p233_p6 }
  0x18   :  { %p236_p9 = pnand %p235_p8, %p229_p5 }
  0x1a   :  { %239 = shalt.err (!%p236_p9)
}
  0x1b   :  { %53 = dma.hbm_to_vmem [thread:$0]  %s284_s1, 32, %s48_s18, [#allocation7], %s255_s13, %s255_s13, %s256_s14  }
  0x1c   :  { %248 = dma.done.wait [#allocation4], 128  }
  0x1d   :  { %249 = vsyncadd [#allocation4], 4294967168 }
  0x1e   :  { %250 = dma.done.wait [#allocation7], 128  }
  0x1f   :  { %251 = vsyncadd [#allocation7], 4294967168  ;;  %v118_v0 = vld [vmem:[#allocation3] sm:$0xff]  ;;  %v140_v6 = vlaneseq  ;;  %v119_v9 = vld [vmem:[#allocation6] sm:$0xff]  ;;  %s258_s1 = smov [#allocation8]  }
  0x20   :  { %v122_v1 = vand.u32 2147483647, %v118_v0  ;;  %v120_v11 = vsub.f32 0.0, %v118_v0  ;;  %v136_v15 = vsub.f32 1.0, %v119_v9 }
  0x21   :  { %v141_v8 = vshrl.u32 %v140_v6, 7  ;;  %v145_v13 = vand.u32 127, %v140_v6 }
  0x22   :  { %v123_v2 = vsub.f32 0.0, %v122_v1  ;;  %v121_v18 = vmax.f32 %v120_v11, 0.0  ;;  %v137_v21 = vmul.f32 %v136_v15, %v118_v0 }
  0x23   :  { %v146_v14 = vmul.u32 128, %v141_v8 }
  0x24   :  { %v124_v3 = vmul.f32 1.442695, %v123_v2 }
  0x25   :  { %v147_v20 = vadd.s32 %v146_v14, %v145_v13 }
  0x26   :  { %196 = vpow2.f32 %v124_v3 }
  0x27   :  { %vm148_vm1 = vcmp.lt.s32.totalorder %v147_v20, 256 }
  0x33   :  { %v197_v4 = vpop.eup %196 }
  0x34   :  { %v126_v5 = vadd.f32 1.0, %v197_v4  ;;  %v129_v7 = vmul.f32 -0.5, %v197_v4  ;;  %v132_v12 = vand.u32 2147483647, %v197_v4 }
  0x36   :  { %198 = vlog2.f32 %v126_v5  ;;  %v130_v10 = vadd.f32 1.0, %v129_v7  ;;  %vm133_vm0 = vcmp.lt.f32.partialorder %v132_v12, 0.0004427343 }
  0x38   :  { %v131_v16 = vmul.f32 %v197_v4, %v130_v10 }
  0x43   :  { %v199_v17 = vpop.eup %198 }
  0x44   :  { %v128_v19 = vmul.f32 0.6931472, %v199_v17 }
  0x46   :  { %v134_v22 = vsel %vm133_vm0, %v131_v16, %v128_v19 }
  0x47   :  { %v135_v23 = vadd.f32 %v134_v22, %v121_v18 }
  0x49   :  { %v138_v24 = vadd.f32 %v137_v21, %v135_v23 }
  0x4b   :  { %v149_v25 = vsel %vm148_vm1, %v138_v24, 0.0 }
  0x4c   :  { %159 = vadd.xlane.f32.xlu0 %v149_v25 }
  0xd5   :  { %v160_v26 = vpop.xlane.xlu0 %159 }
  0xd6   :  { %v161_v27 = vrot.slane %v160_v26, 4 }
  0xd8   :  { %v162_v28 = vadd.f32 %v161_v27, %v160_v26 }
  0xda   :  { %v163_v29 = vrot.slane %v162_v28, 2 }
  0xdc   :  { %v164_v30 = vadd.f32 %v163_v29, %v162_v28 }
  0xde   :  { %v165_v31 = vrot.slane %v164_v30, 1 }
  0xe0   :  { %v166_v32 = vadd.f32 %v165_v31, %v164_v30 }
  0xe2   :  { %189 = vpush %v166_v32 }
 0x113   :  { %s190_s0 = spop %189 }
 0x114   :  { %169 = sst [smem:[#allocation8]] %s190_s0 }
 0x115   :  { %177 = dma.smem_to_hbm %s258_s1, 16, %s285_s2, [#allocation5]  }
 0x116   :  { %252 = dma.done.wait [#allocation5], 16  }
 0x117   :  { %253 = vsyncadd [#allocation5], 4294967280 }
 0x118   :  { %181 = sfence }
 0x119   :  { %182 = vsyncpa [#allocation4], 1 }
 0x11a   :  { %183 = vsyncpa [#allocation7], 1 }
 0x11b   :  { %184 = vsyncpa [#allocation5], 1 }

</bundles_post_ra>
